<compile_context>
chip_gen: v6e
topology: v6e:2x2x1
jax: 0.10.0
libtpu: 0.0.40
codegen_flags: <defaults>
</compile_context>

<pallas_src>
import functools

import jax
import jax.numpy as jnp
from jax.experimental import pallas as pl
from jax.experimental.pallas import tpu as pltpu


# ----------------------------------------------------------------------------
# Pallas kernel: one (batch n, row-tile i) step of the re-parameterized block.
# ----------------------------------------------------------------------------
def _repvgg_kernel(x_ref, w_ref, b_ref, out_ref, acc_ref, *, TH, W):
    # x_ref  : (1, H+2, W+2, Cin)  bf16  padded input image (VMEM-resident over i)
    # w_ref  : (3, 3*Cin, Cout)    bf16  folded 3x3(+1x1) weights, kx-major / Cin-minor
    # b_ref  : (1, Cout)           f32   folded bias (both BN branches summed)
    # out_ref: (1, TH, W, Cout)    f32   output row tile
    # acc_ref: (TH*W, Cout)        f32   VMEM scratch accumulator
    i = pl.program_id(1)
    K3 = w_ref.shape[1]            # 3 * Cin
    Cout = out_ref.shape[-1]

    row0 = pl.multiple_of(i * TH, TH)
    # One load of the TH+2 padded rows this tile needs (halo rows shared by
    # the three ky taps are loaded once).
    slab = x_ref[0, pl.ds(row0, TH + 2), :, :]             # (TH+2, W+2, Cin)

    for ky in range(3):                                    # static unroll (3 iters)
        rows = slab[ky:ky + TH]                            # (TH, W+2, Cin)
        # Fuse the three kx taps along the channel (lane) axis -> K = 3*Cin,
        # matching the (ky, kx-major, Cin-minor) weight layout built in the
        # wrapper.  One fat MXU matmul per ky.
        patch = jnp.concatenate(
            [rows[:, 0:W, :], rows[:, 1:W + 1, :], rows[:, 2:W + 2, :]],
            axis=-1)                                       # (TH, W, 3*Cin)
        contrib = jnp.dot(patch.reshape(TH * W, K3), w_ref[ky],
                          preferred_element_type=jnp.float32)
        if ky == 0:
            acc_ref[...] = contrib
        else:
            acc_ref[...] += contrib

    y = acc_ref[...] + b_ref[...]                          # f32 epilogue
    out_ref[...] = jnp.maximum(y, 0.0).reshape(1, TH, W, Cout).astype(out_ref.dtype)


# ----------------------------------------------------------------------------
# Parameter setup (deterministic), BN folding, wrapper.
# ----------------------------------------------------------------------------
def make_params(key, ch_in, ch_out):
    ks = jax.random.split(key, 10)

    def bn_params(k0, k1, k2, k3, c):
        gamma = 1.0 + 0.1 * jax.random.normal(k0, (c,), jnp.float32)
        beta = 0.1 * jax.random.normal(k1, (c,), jnp.float32)
        running_mean = 0.1 * jax.random.normal(k2, (c,), jnp.float32)
        running_var = jnp.abs(jax.random.normal(k3, (c,), jnp.float32)) + 0.5
        return gamma, beta, running_mean, running_var

    return {
        # PyTorch conv weight layout: (Cout, Cin, kH, kW)
        "w3": 0.1 * jax.random.normal(ks[0], (ch_out, ch_in, 3, 3), jnp.float32),
        "w1": 0.1 * jax.random.normal(ks[1], (ch_out, ch_in, 1, 1), jnp.float32),
        "bn3": bn_params(ks[2], ks[3], ks[4], ks[5], ch_out),
        "bn1": bn_params(ks[6], ks[7], ks[8], ks[9], ch_out),
    }


def _fold_bn(w_oihw, bn, eps=1e-5):
    """Fold eval-mode BatchNorm into conv weight/bias (same as _fuse_bn_tensor)."""
    gamma, beta, mean, var = bn
    std = jnp.sqrt(var + eps)
    scale = gamma / std                              # (Cout,)
    w = w_oihw * scale[:, None, None, None]          # (Cout, Cin, kH, kW)
    b = beta - mean * scale                          # (Cout,)
    return w, b


def _pick_row_tile(H, target):
    """Largest divisor of H that is <= target (sweep larger on v6e/v5e)."""
    th = max(1, min(H, target))
    while H % th:
        th -= 1
    return th


def repvgg_forward(x_nchw, params, *, row_tile_rows=8):
    N, Cin, H, W = x_nchw.shape

    w3f, b3f = _fold_bn(params["w3"], params["bn3"])
    w1f, b1f = _fold_bn(params["w1"], params["bn1"])
    Cout = w3f.shape[0]

    # RepVGG re-param: fold 1x1 branch into the 3x3 center tap, sum the biases.
    w3f = w3f.at[:, :, 1, 1].add(w1f[:, :, 0, 0])
    bias = (b3f + b1f).reshape(1, Cout)              # stays f32

    # (Cout, Cin, 3, 3) -> (ky, kx, Cin, Cout) -> (3, 3*Cin, Cout), kx-major/Cin-minor
    # to match the in-kernel concat of the three kx taps. bf16 MXU operands.
    w_k = jnp.transpose(w3f, (2, 3, 1, 0)).reshape(3, 3 * Cin, Cout)
    w_k = w_k.astype(jnp.bfloat16)

    # NCHW -> NHWC (+ pad=1 halo), bf16 activations.
    # TODO(synk): keep NHWC end-to-end across the network and handle the halo
    # in-kernel to drop these extra HBM round-trips from the hot path.
    x = jnp.transpose(x_nchw, (0, 2, 3, 1)).astype(jnp.bfloat16)
    xpad = jnp.pad(x, ((0, 0), (1, 1), (1, 1), (0, 0)))

    # TODO(synk): pad Cin/Cout to multiples of 128 for lane-dense MXU operands
    # and unmasked stores at toy channel counts (RT-DETR production channels
    # are 256, already lane-aligned).
    TH = _pick_row_tile(H, row_tile_rows)

    out_nhwc = pl.pallas_call(
        functools.partial(_repvgg_kernel, TH=TH, W=W),
        grid=(N, H // TH),
        in_specs=[
            # Whole padded image per batch element; constant over the row-tile
            # axis -> stays VMEM-resident, no re-DMA per row tile.
            pl.BlockSpec((1, H + 2, W + 2, Cin), lambda n, i: (n, 0, 0, 0)),
            pl.BlockSpec((3, 3 * Cin, Cout), lambda n, i: (0, 0, 0)),
            pl.BlockSpec((1, Cout), lambda n, i: (0, 0)),
        ],
        out_specs=pl.BlockSpec((1, TH, W, Cout), lambda n, i: (n, i, 0, 0)),
        out_shape=jax.ShapeDtypeStruct((N, H, W, Cout), jnp.float32),
        scratch_shapes=[pltpu.VMEM((TH * W, Cout), jnp.float32)],
        compiler_params=pltpu.CompilerParams(
            dimension_semantics=("parallel", "parallel")),
    )(xpad, w_k, bias)

    return jnp.transpose(out_nhwc, (0, 3, 1, 2))     # back to NCHW


def repvgg_reference(x_nchw, params):
    """Plain-JAX f32 two-branch reference (mirrors the PyTorch module math)."""
    w3f, b3f = _fold_bn(params["w3"], params["bn3"])
    w1f, b1f = _fold_bn(params["w1"], params["bn1"])
    dn = jax.lax.conv_dimension_numbers(x_nchw.shape, w3f.shape,
                                        ("NCHW", "OIHW", "NCHW"))
    y3 = jax.lax.conv_general_dilated(x_nchw, w3f, (1, 1), ((1, 1), (1, 1)),
                                      dimension_numbers=dn)
    y1 = jax.lax.conv_general_dilated(x_nchw, w1f, (1, 1), ((0, 0), (0, 0)),
                                      dimension_numbers=dn)
    y = y3 + b3f[None, :, None, None] + y1 + b1f[None, :, None, None]
    return jnp.maximum(y, 0.0)


if __name__ == "__main__":
    key = jax.random.PRNGKey(0)
    k_x, k_p = jax.random.split(key)

    N, C_in, C_out, H, W = 2, 4, 8, 16, 16
    x = jax.random.normal(k_x, (N, C_in, H, W), jnp.float32)
    params = make_params(k_p, C_in, C_out)

    out = jax.block_until_ready(repvgg_forward(x, params))
    ref = jax.block_until_ready(repvgg_reference(x, params))

    assert out.shape == (N, C_out, H, W)
    # bf16 MXU operands vs f32 reference -> loose tolerance; a tap/weight
    # ordering bug would produce O(0.3+) errors and still be caught.
    assert jnp.allclose(out, ref, atol=5e-2, rtol=5e-2), "mismatch vs reference"

    print("KERNEL_OK")
</pallas_src>

<mosaic_0001>
module attributes {stable_mosaic.version = 11 : i64} {
  func.func @_repvgg_kernel(%arg0: i32, %arg1: i32, %arg2: memref<1x18x18x4xbf16, #tpu.memory_space<vmem>>, %arg3: memref<3x12x8xbf16, #tpu.memory_space<vmem>>, %arg4: memref<1x8xf32, #tpu.memory_space<vmem>>, %arg5: memref<1x8x16x8xf32, #tpu.memory_space<vmem>>, %arg6: memref<128x8xf32, #tpu.memory_space<vmem>>) attributes {dimension_semantics = [#tpu.dimension_semantics<parallel>, #tpu.dimension_semantics<parallel>], iteration_bounds = array<i64: 2, 2>, scalar_prefetch = 0 : i64, scratch_operands = 1 : i64, tpu.core_type = #tpu.core_type<tc>, window_params = [{transform_indices = @transform_0, window_bounds = array<i64: 1, 18, 18, 4>}, {pipeline_mode = #tpu.pipeline_mode<synchronous>, transform_indices = @transform_1, window_bounds = array<i64: 3, 12, 8>}, {pipeline_mode = #tpu.pipeline_mode<synchronous>, transform_indices = @transform_2, window_bounds = array<i64: 1, 8>}, {transform_indices = @transform_3, window_bounds = array<i64: 1, 8, 16, 8>}]} {
    %c8_i32 = arith.constant 8 : i32
    %0 = arith.muli %arg1, %c8_i32 : i32
    %1 = tpu.assume_multiple %0, 8 : i32
    %c0 = arith.constant 0 : index
    %2 = arith.index_cast %1 : i32 to index
    %c0_0 = arith.constant 0 : index
    %c0_1 = arith.constant 0 : index
    %3 = vector.load %arg2[%c0, %2, %c0_0, %c0_1] : memref<1x18x18x4xbf16, #tpu.memory_space<vmem>>, vector<1x10x18x4xbf16>
    %4 = vector.shape_cast %3 : vector<1x10x18x4xbf16> to vector<10x18x4xbf16>
    %5 = vector.extract_strided_slice %4 {offsets = [0, 0, 0], sizes = [8, 18, 4], strides = [1, 1, 1]} : vector<10x18x4xbf16> to vector<8x18x4xbf16>
    %6 = vector.extract_strided_slice %5 {offsets = [0, 0, 0], sizes = [8, 16, 4], strides = [1, 1, 1]} : vector<8x18x4xbf16> to vector<8x16x4xbf16>
    %7 = vector.extract_strided_slice %5 {offsets = [0, 1, 0], sizes = [8, 16, 4], strides = [1, 1, 1]} : vector<8x18x4xbf16> to vector<8x16x4xbf16>
    %8 = vector.extract_strided_slice %5 {offsets = [0, 2, 0], sizes = [8, 16, 4], strides = [1, 1, 1]} : vector<8x18x4xbf16> to vector<8x16x4xbf16>
    %9 = tpu.concatenate %6, %7, %8 in 2 : vector<8x16x4xbf16>, vector<8x16x4xbf16>, vector<8x16x4xbf16> -> vector<8x16x12xbf16>
    %10 = vector.shape_cast %9 : vector<8x16x12xbf16> to vector<128x12xbf16>
    %c0_2 = arith.constant 0 : index
    %c0_3 = arith.constant 0 : index
    %c0_4 = arith.constant 0 : index
    %11 = vector.load %arg3[%c0_2, %c0_3, %c0_4] : memref<3x12x8xbf16, #tpu.memory_space<vmem>>, vector<1x12x8xbf16>
    %12 = vector.shape_cast %11 : vector<1x12x8xbf16> to vector<12x8xbf16>
    %cst = arith.constant dense<0.000000e+00> : vector<128x8xf32>
    %13 = tpu.matmul %10, %12, %cst {dimension_numbers = #tpu.dot_dimension_numbers<[1], [0], [0], [1], [0, 0, 1, 1], [], []>} : vector<128x12xbf16>, vector<12x8xbf16>, vector<128x8xf32> -> vector<128x8xf32>
    %c0_5 = arith.constant 0 : index
    %c0_6 = arith.constant 0 : index
    %14 = vector.load %arg6[%c0_5, %c0_6] : memref<128x8xf32, #tpu.memory_space<vmem>>, vector<128x8xf32>
    tpu.vector_store %arg6[%c0_5, %c0_6], %13 {strides = array<i32>} : memref<128x8xf32, #tpu.memory_space<vmem>>, vector<128x8xf32>,
    %15 = vector.extract_strided_slice %4 {offsets = [1, 0, 0], sizes = [8, 18, 4], strides = [1, 1, 1]} : vector<10x18x4xbf16> to vector<8x18x4xbf16>
    %16 = vector.extract_strided_slice %15 {offsets = [0, 0, 0], sizes = [8, 16, 4], strides = [1, 1, 1]} : vector<8x18x4xbf16> to vector<8x16x4xbf16>
    %17 = vector.extract_strided_slice %15 {offsets = [0, 1, 0], sizes = [8, 16, 4], strides = [1, 1, 1]} : vector<8x18x4xbf16> to vector<8x16x4xbf16>
    %18 = vector.extract_strided_slice %15 {offsets = [0, 2, 0], sizes = [8, 16, 4], strides = [1, 1, 1]} : vector<8x18x4xbf16> to vector<8x16x4xbf16>
    %19 = tpu.concatenate %16, %17, %18 in 2 : vector<8x16x4xbf16>, vector<8x16x4xbf16>, vector<8x16x4xbf16> -> vector<8x16x12xbf16>
    %20 = vector.shape_cast %19 : vector<8x16x12xbf16> to vector<128x12xbf16>
    %c1 = arith.constant 1 : index
    %c0_7 = arith.constant 0 : index
    %c0_8 = arith.constant 0 : index
    %21 = vector.load %arg3[%c1, %c0_7, %c0_8] : memref<3x12x8xbf16, #tpu.memory_space<vmem>>, vector<1x12x8xbf16>
    %22 = vector.shape_cast %21 : vector<1x12x8xbf16> to vector<12x8xbf16>
    %cst_9 = arith.constant dense<0.000000e+00> : vector<128x8xf32>
    %23 = tpu.matmul %20, %22, %cst_9 {dimension_numbers = #tpu.dot_dimension_numbers<[1], [0], [0], [1], [0, 0, 1, 1], [], []>} : vector<128x12xbf16>, vector<12x8xbf16>, vector<128x8xf32> -> vector<128x8xf32>
    %c0_10 = arith.constant 0 : index
    %c0_11 = arith.constant 0 : index
    %24 = vector.load %arg6[%c0_10, %c0_11] : memref<128x8xf32, #tpu.memory_space<vmem>>, vector<128x8xf32>
    %25 = arith.addf %24, %23 : vector<128x8xf32>
    %c0_12 = arith.constant 0 : index
    %c0_13 = arith.constant 0 : index
    %26 = vector.load %arg6[%c0_12, %c0_13] : memref<128x8xf32, #tpu.memory_space<vmem>>, vector<128x8xf32>
    tpu.vector_store %arg6[%c0_12, %c0_13], %25 {strides = array<i32>} : memref<128x8xf32, #tpu.memory_space<vmem>>, vector<128x8xf32>,
    %27 = vector.extract_strided_slice %4 {offsets = [2, 0, 0], sizes = [8, 18, 4], strides = [1, 1, 1]} : vector<10x18x4xbf16> to vector<8x18x4xbf16>
    %28 = vector.extract_strided_slice %27 {offsets = [0, 0, 0], sizes = [8, 16, 4], strides = [1, 1, 1]} : vector<8x18x4xbf16> to vector<8x16x4xbf16>
    %29 = vector.extract_strided_slice %27 {offsets = [0, 1, 0], sizes = [8, 16, 4], strides = [1, 1, 1]} : vector<8x18x4xbf16> to vector<8x16x4xbf16>
    %30 = vector.extract_strided_slice %27 {offsets = [0, 2, 0], sizes = [8, 16, 4], strides = [1, 1, 1]} : vector<8x18x4xbf16> to vector<8x16x4xbf16>
    %31 = tpu.concatenate %28, %29, %30 in 2 : vector<8x16x4xbf16>, vector<8x16x4xbf16>, vector<8x16x4xbf16> -> vector<8x16x12xbf16>
    %32 = vector.shape_cast %31 : vector<8x16x12xbf16> to vector<128x12xbf16>
    %c2 = arith.constant 2 : index
    %c0_14 = arith.constant 0 : index
    %c0_15 = arith.constant 0 : index
    %33 = vector.load %arg3[%c2, %c0_14, %c0_15] : memref<3x12x8xbf16, #tpu.memory_space<vmem>>, vector<1x12x8xbf16>
    %34 = vector.shape_cast %33 : vector<1x12x8xbf16> to vector<12x8xbf16>
    %cst_16 = arith.constant dense<0.000000e+00> : vector<128x8xf32>
    %35 = tpu.matmul %32, %34, %cst_16 {dimension_numbers = #tpu.dot_dimension_numbers<[1], [0], [0], [1], [0, 0, 1, 1], [], []>} : vector<128x12xbf16>, vector<12x8xbf16>, vector<128x8xf32> -> vector<128x8xf32>
    %c0_17 = arith.constant 0 : index
    %c0_18 = arith.constant 0 : index
    %36 = vector.load %arg6[%c0_17, %c0_18] : memref<128x8xf32, #tpu.memory_space<vmem>>, vector<128x8xf32>
    %37 = arith.addf %36, %35 : vector<128x8xf32>
    %c0_19 = arith.constant 0 : index
    %c0_20 = arith.constant 0 : index
    %38 = vector.load %arg6[%c0_19, %c0_20] : memref<128x8xf32, #tpu.memory_space<vmem>>, vector<128x8xf32>
    tpu.vector_store %arg6[%c0_19, %c0_20], %37 {strides = array<i32>} : memref<128x8xf32, #tpu.memory_space<vmem>>, vector<128x8xf32>,
    %c0_21 = arith.constant 0 : index
    %c0_22 = arith.constant 0 : index
    %39 = vector.load %arg6[%c0_21, %c0_22] : memref<128x8xf32, #tpu.memory_space<vmem>>, vector<128x8xf32>
    %c0_23 = arith.constant 0 : index
    %c0_24 = arith.constant 0 : index
    %40 = vector.load %arg4[%c0_23, %c0_24] : memref<1x8xf32, #tpu.memory_space<vmem>>, vector<1x8xf32>
    %41 = vector.broadcast %40 : vector<1x8xf32> to vector<128x8xf32>
    %42 = arith.addf %39, %41 : vector<128x8xf32>
    %cst_25 = arith.constant 0.000000e+00 : f32
    %43 = vector.broadcast %cst_25 : f32 to vector<128x8xf32>
    %44 = arith.maximumf %42, %43 : vector<128x8xf32>
    %45 = vector.shape_cast %44 : vector<128x8xf32> to vector<1x8x16x8xf32>
    %c0_26 = arith.constant 0 : index
    %c0_27 = arith.constant 0 : index
    %c0_28 = arith.constant 0 : index
    %c0_29 = arith.constant 0 : index
    %46 = vector.load %arg5[%c0_26, %c0_27, %c0_28, %c0_29] : memref<1x8x16x8xf32, #tpu.memory_space<vmem>>, vector<1x8x16x8xf32>
    tpu.vector_store %arg5[%c0_26, %c0_27, %c0_28, %c0_29], %45 {strides = array<i32>} : memref<1x8x16x8xf32, #tpu.memory_space<vmem>>, vector<1x8x16x8xf32>,
    return
  }
  func.func @transform_0(%arg0: i32, %arg1: i32) -> (i32, i32, i32, i32) {
    %c0_i32 = arith.constant 0 : i32
    %c0_i32_0 = arith.constant 0 : i32
    %c0_i32_1 = arith.constant 0 : i32
    %c0_i32_2 = arith.constant 0 : i32
    return %arg0, %c0_i32, %c0_i32_0, %c0_i32_1 : i32, i32, i32, i32
  }
  func.func @transform_1(%arg0: i32, %arg1: i32) -> (i32, i32, i32) {
    %c0_i32 = arith.constant 0 : i32
    %c0_i32_0 = arith.constant 0 : i32
    %c0_i32_1 = arith.constant 0 : i32
    %c0_i32_2 = arith.constant 0 : i32
    return %c0_i32, %c0_i32_0, %c0_i32_1 : i32, i32, i32
  }
  func.func @transform_2(%arg0: i32, %arg1: i32) -> (i32, i32) {
    %c0_i32 = arith.constant 0 : i32
    %c0_i32_0 = arith.constant 0 : i32
    %c0_i32_1 = arith.constant 0 : i32
    return %c0_i32, %c0_i32_0 : i32, i32
  }
  func.func @transform_3(%arg0: i32, %arg1: i32) -> (i32, i32, i32, i32) {
    %c0_i32 = arith.constant 0 : i32
    %c0_i32_0 = arith.constant 0 : i32
    %c0_i32_1 = arith.constant 0 : i32
    return %arg0, %arg1, %c0_i32, %c0_i32_0 : i32, i32, i32, i32
  }
}

</mosaic_0001>

<bundles_post_ra>
// kernel: tpu_custom_call.1
= control target key start
LH: loop header
LB: loop body
LE: loop exit
PB: predicated region body
PF: predicated region fallthrough
CT: control target
= control target key end

     0   :  { %s1448_s12 = smov 0   ;;  %s1450_s13 = smov 0   ;;  %s1802_s0 = inlined_call_operand.vmem [shape: bf16[2,18,18,4], index: 0, kind: input, shape index: {}]   ;;  %s1803_s1 = inlined_call_operand.vmem [shape: bf16[3,12,8], index: 1, kind: input, shape index: {}]   ;;  %s1804_s2 = inlined_call_operand.vmem [shape: f32[1,8], index: 2, kind: input, shape index: {}]   ;;  %s1805_s3 = inlined_call_operand.vmem [shape: f32[2,16,16,8], index: 3, kind: output, shape index: {}]  }
   0x1   :  { %s1452_s14 = smov 0   ;;  %s1454_s15 = smov 0  }
   0x2   :  { %s1456_s16 = smov 0  }
   0x3 LB: > { %s22_s17 = sadd.s32 1, %s1416_s14  ;;  %s25_s18 = sadd.s32 1, %s1420_s15  ;;  %s1424_s16 = sphi %s1456_s16, %s13_s16   ;;  %s1420_s15 = sphi %s1454_s15, %s1809_s15   ;;  %s1416_s14 = sphi %s1452_s14, %s1808_s14   ;;  %s1412_s13 = sphi %s1450_s13, %s1807_s13   ;;  %s1408_s12 = sphi %s1448_s12, %s1806_s12  }
   0x4   : > { %p23_p0 = scmp.ge.s32.totalorder %s22_s17, 2  ;;  %p1169_p1 = scmp.ge.s32.totalorder %s1424_s16, 1 }
   0x5   : > { %p151_p2 = scmp.lt.s32.totalorder %s1424_s16, 5 }
   0x6   : > { %s1811_s17 = smov (%p23_p0, %s22_s17), 0  ;;  %s1813_s18 = smov (!%p23_p0, %s25_s18), %s1420_s15 }
   0x7   : > { %p152_p3 = pnand %p1169_p1, %p151_p2  ;;  %p27_p4 = scmp.ge.s32.totalorder %s1813_s18, 2 }
   0x8   : > { %p180_p5 = scmp.lt.s32.totalorder (!%p152_p3), %s1412_s13, 1  ;;  %s1232_s19 = smul.u32 (!%p152_p3), 96, %s1408_s12 }
   0x9   : > { %s1815_s18 = smov (%p27_p4, %s1813_s18), 0  ;;  %155 = sbr.rel (%p152_p3) target bundleno = 416 (0x1a0), region = 32 }
   0xa   : > { %s1426_s25 = smov (!%p152_p3), 8   ;;  %s1427_s26 = smov (!%p152_p3), 4  }
   0xb   : > { %s1171_s6 = sshll.u32 (!%p152_p3), %s1408_s12, 3 }
   0xc   : > { %p188_p6 = scmp.lt.s32.totalorder (!%p152_p3), %s1171_s6, 15 }
   0xe   : > { %s1817_s13 = smov (!%p180_p5, %s1412_s13), 1  ;;  %vm408_vm0 = vcmask 1046528   ;;  %vm295_vm1 = vsmask.f32 7424  ;;  %vm507_vm2 = vcmask 1045504   ;;  %vm449_vm3 = vcmask 31744  }
   0xf   : > { %s1320_s20 = smul.u32 216, %s1817_s13  ;;  %vm466_vm4 = vcmask 64512   ;;  %vm490_vm5 = vcmask 97280   ;;  %s1819_s6 = smov (!%p188_p6, %s1171_s6), 15 }
  0x10   : > { %s1172_s7 = sshll.u32 %s1819_s6, 1  ;;  %s1173_s8 = sshll.u32 %s1817_s13, 5 }
  0x11   : > { %s184_s23 = scalar_lea.vmem %s1802_s0, %s1320_s20  ;;  %s1703_s9 = sadd.s32 %s1173_s8, %s1172_s7 }
  0x12   : > { %s1487_s24 = scalar_lea.vmem %s184_s23, %s1232_s19  ;;  %s1174_s12 = sshll.u32 %s1703_s9, 3 }
  0x13   : > { %v1490_v0 = vld [vmem:[%s1487_s24 + $0x48] sm:$0xff]   ;;  %v1493_v1 = vld [vmem:[%s1487_s24 + $0x50] ss:$0 sps:$4 sm:$0x11]   ;;  %v1502_v6 = vld [vmem:[%s1487_s24 + $0x3c] sm:$0xff]   ;;  %s1722_s20 = scalar_lea.vmem %s1805_s3, %s1174_s12 }
  0x14   : > { %v1496_v2 = vld [vmem:[%s1487_s24 + $0x30] sm:$0xff]   ;;  %v427_v3 = vrot.slane %v1490_v0, 1  ;;  %v428_v4 = vrot.slane %v1493_v1, 1  ;;  %v1366_v5 = vld [vmem:[%s1487_s24 + $0x38] ss:$0 sps:$4 sm:$0x11]  }
  0x15   : > { %v421_v7 = vrot.slane %v1496_v2, 1  ;;  %v345_v8 = vshrl.u32 %v1496_v2, 16  ;;  %v422_v10 = vrot.slane %v1366_v5, 1  ;;  %v1368_v11 = vld [vmem:[%s1487_s24 + $0x44] ss:$0 sps:$4 sm:$0x11]  }
  0x16   : > { %v429_v9 = vsel %vm408_vm0, %v427_v3, %v428_v4  ;;  %v424_v12 = vrot.slane %v1502_v6, 1  ;;  %v347_v13 = vshll.u32 %v1496_v2, 16  ;;  %v352_v14 = vshll.u32 %v1366_v5, 16  ;;  %v1512_v15 = vld [vmem:[%s1487_s24 + $0x54] sm:$0xff]   ;;  %v1523_v27 = vld [vmem:[%s1487_s24] sm:$0xff]   ;;  %v1527_v35 = vld [vmem:[%s1487_s24 + $0xc] sm:$0xff]  }
  0x17   : > { %445 = vrot.lane.b32.xlu0 %v429_v9, %s1426_s25  ;;  %v423_v16 = vsel %vm408_vm0, %v421_v7, %v422_v10  ;;  %v425_v17 = vrot.slane %v1368_v11, 1  ;;  %v357_v18 = vshrl.u32 %v1502_v6, 16  ;;  %v1370_v21 = vld [vmem:[%s1487_s24 + $0x5c] ss:$0 sps:$4 sm:$0x11]   ;;  %v381_v22 = vshrl.u32 %v1512_v15, 16 }
  0x18   : > { %441 = vrot.lane.b32.xlu1 %v423_v16, %s1426_s25  ;;  %v349_v19 = vrot.slane %v347_v13, 1  ;;  %v354_v20 = vrot.slane %v352_v14, 1  ;;  %v383_v24 = vshll.u32 %v1512_v15, 16  ;;  %v359_v25 = vshll.u32 %v1502_v6, 16  ;;  %v1545_v56 = vld [vmem:[%s1487_s24 + $0x18] sm:$0xff]   ;;  %v1556_v7 = vld [vmem:[%s1487_s24 + $0x60] sm:$0xff]  }
  0x19   : > { %v426_v23 = vsel %vm408_vm0, %v424_v12, %v425_v17  ;;  %v364_v26 = vshll.u32 %v1368_v11, 16  ;;  %v388_v29 = vshll.u32 %v1370_v21, 16  ;;  %v430_v30 = vrot.slane %v1512_v15, 1  ;;  %v1372_v38 = vld [vmem:[%s1487_s24 + $0x8] ss:$0 sps:$4 sm:$0x11]  }
  0x1a   : > { %v350_v28 = vor.u32 %v349_v19, %v345_v8  ;;  %v431_v31 = vrot.slane %v1370_v21, 1  ;;  %v385_v32 = vrot.slane %v383_v24, 1  ;;  %v361_v33 = vrot.slane %v359_v25, 1  ;;  %v1374_v52 = vld [vmem:[%s1487_s24 + $0x14] ss:$0 sps:$4 sm:$0x11]  }
  0x1b   : > { %v366_v34 = vrot.slane %v364_v26, 1  ;;  %v390_v37 = vrot.slane %v388_v29, 1  ;;  %v297_v39 = vshrl.u32 %v1523_v27, 16  ;;  %v299_v40 = vshll.u32 %v1523_v27, 16 }
  0x1c   : > { %443 = vrot.lane.b32.xlu1 %v426_v23, %s1426_s25  ;;  %v355_v36 = vsel %vm295_vm1, %v350_v28, %v354_v20  ;;  %v386_v41 = vor.u32 %v385_v32, %v381_v22  ;;  %v362_v42 = vor.u32 %v361_v33, %v357_v18  ;;  %v369_v43 = vshrl.u32 %v1490_v0, 16  ;;  %v1376_v5 = vld [vmem:[%s1487_s24 + $0x20] ss:$0 sps:$4 sm:$0x11]   ;;  %v1576_v32 = vld [vmem:[%s1487_s24 + $0x6c] sm:$0xff]  }
  0x1d   : > { %400 = vrot.lane.b32.xlu0 %v355_v36, %s1427_s26  ;;  %v371_v44 = vshll.u32 %v1490_v0, 16  ;;  %v301_v45 = vrot.slane %v299_v40, 1  ;;  %v304_v46 = vshll.u32 %v1372_v38, 16  ;;  %v376_v47 = vshll.u32 %v1493_v1, 16  ;;  %v1552_v1 = vld [vmem:[%s1487_s24 + $0x24] sm:$0xff]  }
  0x1e   : > { %v309_v48 = vshrl.u32 %v1527_v35, 16  ;;  %v391_v49 = vsel %vm295_vm1, %v386_v41, %v390_v37  ;;  %v367_v50 = vsel %vm295_vm1, %v362_v42, %v366_v34  ;;  %v311_v53 = vshll.u32 %v1527_v35, 16  ;;  %v1378_v14 = vld [vmem:[%s1487_s24 + $0x2c] ss:$0 sps:$4 sm:$0x11]  }
  0x1f   : > { %v373_v51 = vrot.slane %v371_v44, 1  ;;  %v302_v54 = vor.u32 %v301_v45, %v297_v39  ;;  %v306_v55 = vrot.slane %v304_v46, 1  ;;  %v432_v57 = vsel %vm408_vm0, %v430_v30, %v431_v31  ;;  %v1380_v26 = vld [vmem:[%s1487_s24 + $0x68] ss:$0 sps:$4 sm:$0x11]  }
  0x20   : > { %406 = vrot.lane.b32.xlu1 %v391_v49, %s1427_s26  ;;  %v313_v58 = vrot.slane %v311_v53, 1  ;;  %v316_v59 = vshll.u32 %v1374_v52, 16  ;;  %v378_v62 = vrot.slane %v376_v47, 1  ;;  %v409_v63 = vrot.slane %v1523_v27, 1  ;;  %v1384_v39 = vld [vmem:[%s1803_s1 + $0x8] sm:$0x3f]  }
  0x21   : > { %402 = vrot.lane.b32.xlu0 %v367_v50, %s1427_s26  ;;  %v307_v60 = vsel %vm295_vm1, %v302_v54, %v306_v55  ;;  %v374_v61 = vor.u32 %v373_v51, %v369_v43  ;;  %v410_v8 = vrot.slane %v1372_v38, 1  ;;  %v323_v9 = vshll.u32 %v1545_v56, 16  ;;  %v1383_v38 = vld [vmem:[%s1803_s1] sm:$0x3f]   ;;  %v1385_v44 = vld [vmem:[%s1803_s1 + $0x10] sm:$0x3f]  }
  0x22   : > { %v314_v3 = vor.u32 %v313_v58, %v309_v48  ;;  %v318_v4 = vrot.slane %v316_v59, 1  ;;  %v412_v11 = vrot.slane %v1527_v35, 1  ;;  %v413_v12 = vrot.slane %v1374_v52, 1  ;;  %v1382_v46 = vld [vmem:[%s1487_s24 + $0x74] ss:$0 sps:$4 sm:$0x11]   ;;  %1317 = vmatprep.subr.msk.bf16.mxu1 %vm507_vm2, %v1383_v38  ;;  %1316 = vmatprep.subr.msk.bf16.mxu0 %vm507_vm2, %v1383_v38 }
  0x23   : > { %v321_v13 = vshrl.u32 %v1545_v56, 16  ;;  %v379_v16 = vsel %vm295_vm1, %v374_v61, %v378_v62  ;;  %v325_v17 = vrot.slane %v323_v9, 1  ;;  %v328_v18 = vshll.u32 %v1376_v5, 16 }
  0x24   : > { %392 = vrot.lane.b32.xlu1 %v307_v60, %s1427_s26  ;;  %v319_v10 = vsel %vm295_vm1, %v314_v3, %v318_v4  ;;  %v335_v19 = vshll.u32 %v1552_v1, 16  ;;  %v415_v20 = vrot.slane %v1545_v56, 1  ;;  %v416_v21 = vrot.slane %v1376_v5, 1 }
  0x25   : > { %447 = vrot.lane.b32.xlu0 %v432_v57, %s1426_s25  ;;  %v333_v22 = vshrl.u32 %v1552_v1, 16  ;;  %v340_v24 = vshll.u32 %v1378_v14, 16  ;;  %v414_v25 = vsel %vm408_vm0, %v412_v11, %v413_v12  ;;  %v635_v28 = vshll.u32 %v1556_v7, 16 }
  0x26   : > { %v337_v23 = vrot.slane %v335_v19, 1  ;;  %v411_v29 = vsel %vm408_vm0, %v409_v63, %v410_v8  ;;  %v326_v30 = vor.u32 %v325_v17, %v321_v13  ;;  %v330_v31 = vrot.slane %v328_v18, 1 }
  0x27   : > { %v418_v33 = vrot.slane %v1552_v1, 1  ;;  %v417_v34 = vsel %vm408_vm0, %v415_v20, %v416_v21  ;;  %v419_v36 = vrot.slane %v1378_v14, 1  ;;  %v633_v37 = vshrl.u32 %v1556_v7, 16 }
  0x28   : > { %394 = vrot.lane.b32.xlu1 %v319_v10, %s1427_s26  ;;  %v338_v40 = vor.u32 %v337_v23, %v333_v22  ;;  %v342_v41 = vrot.slane %v340_v24, 1  ;;  %v637_v42 = vrot.slane %v635_v28, 1  ;;  %v640_v43 = vshll.u32 %v1380_v26, 16 }
  0x29   : > { %404 = vrot.lane.b32.xlu0 %v379_v16, %s1427_s26  ;;  %v331_v45 = vsel %vm295_vm1, %v326_v30, %v330_v31  ;;  %v824_v47 = vshll.u32 %v1576_v32, 16  ;;  %v509_v48 = vsel %vm507_vm2, %v1383_v38, 0  ;;  %v666_v49 = vsel %vm507_vm2, %v1384_v39, 0 }
  0x2a   : > { %1315 = vmatpush3.bf16.msra.mxu1 %v509_v48  ;;  %1261 = vmatpush3.bf16.msra.mxu0 %v509_v48  ;;  %v420_v50 = vsel %vm408_vm0, %v418_v33, %v419_v36  ;;  %v855_v51 = vsel %vm507_vm2, %v1385_v44, 0  ;;  %v343_v52 = vsel %vm295_vm1, %v338_v40, %v342_v41  ;;  %v646_v53 = vrot.slane %v1556_v7, 1 }
  0x2b   : > { %1318 = vmatprep.subr.msk.bf16.mxu1 %vm507_vm2, %v1384_v39  ;;  %v647_v54 = vrot.slane %v1380_v26, 1  ;;  %v822_v55 = vshrl.u32 %v1576_v32, 16  ;;  %1319 = vmatprep.subr.msk.bf16.mxu0 %vm507_vm2, %v1385_v44  ;;  %v638_v57 = vor.u32 %v637_v42, %v633_v37  ;;  %v642_v58 = vrot.slane %v640_v43, 1 }
  0x2c   : > { %435 = vrot.lane.b32.xlu1 %v414_v25, %s1426_s25  ;;  %v826_v59 = vrot.slane %v824_v47, 1  ;;  %v829_v60 = vshll.u32 %v1382_v46, 16  ;;  %v835_v62 = vrot.slane %v1576_v32, 1  ;;  %v836_v63 = vrot.slane %v1382_v46, 1 }
  0x2d   : > { %433 = vrot.lane.b32.xlu0 %v411_v29, %s1426_s25  ;;  %v648_v61 = vsel %vm408_vm0, %v646_v53, %v647_v54  ;;  %v643_v3 = vsel %vm295_vm1, %v638_v57, %v642_v58 }
  0x2e   : > { %v827_v4 = vor.u32 %v826_v59, %v822_v55  ;;  %v831_v5 = vrot.slane %v829_v60, 1  ;;  %v837_v8 = vsel %vm408_vm0, %v835_v62, %v836_v63 }
  0x30   : > { %437 = vrot.lane.b32.xlu1 %v417_v34, %s1426_s25  ;;  %v832_v9 = vsel %vm295_vm1, %v827_v4, %v831_v5 }
  0x31   : > { %396 = vrot.lane.b32.xlu0 %v331_v45, %s1427_s26 }
  0x34   : > { %439 = vrot.lane.b32.xlu1 %v420_v50, %s1426_s25 }
  0x35   : > { %398 = vrot.lane.b32.xlu0 %v343_v52, %s1427_s26 }
  0x38   : > { %649 = vrot.lane.b32.xlu1 %v648_v61, %s1426_s25 }
  0x39   : > { %644 = vrot.lane.b32.xlu0 %v643_v3, %s1427_s26 }
  0x3c   : > { %838 = vrot.lane.b32.xlu1 %v837_v8, %s1426_s25 }
  0x3d   : > { %833 = vrot.lane.b32.xlu0 %v832_v9, %s1427_s26 }
  0x89   : > { %v446_v10 = vpop.permute.xlu0 %445 }
  0x8a   : > { %v442_v11 = vpop.permute.xlu1 %441 }
  0x8e   : > { %v444_v12 = vpop.permute.xlu1 %443 }
  0x8f   : > { %v401_v13 = vpop.permute.xlu0 %400 }
  0x90   : > { %v459_v14 = vsel %vm449_vm3, %v1496_v2, %v401_v13 }
  0x91   : > { %v476_v16 = vsel %vm466_vm4, %v459_v14, %v442_v11 }
  0x92   : > { %1270 = vmatprep.mubr.msk.bf16.mxu1 %vm490_vm5, %v476_v16  ;;  %v407_v17 = vpop.permute.xlu1 %406 }
  0x93   : > { %v403_v18 = vpop.permute.xlu0 %402  ;;  %v465_v25 = vsel %vm449_vm3, %v1512_v15, %v407_v17 }
  0x94   : > { %v461_v19 = vsel %vm449_vm3, %v1502_v6, %v403_v18 }
  0x95   : > { %v478_v20 = vsel %vm466_vm4, %v461_v19, %v444_v12 }
  0x96   : > { %1271 = vmatmul.mubr.msk.bf16.vlgmr.msra.gmra.mxu1 %vm490_vm5, %v478_v20  ;;  %v393_v21 = vpop.permute.xlu1 %392 }
  0x97   : > { %v448_v22 = vpop.permute.xlu0 %447  ;;  %1279 = vmatpush3.bf16.msra.mxu1 %v666_v49  ;;  %v451_v30 = vsel %vm449_vm3, %v1523_v27, %v393_v21 }
  0x98   : > { %v482_v28 = vsel %vm466_vm4, %v465_v25, %v448_v22 }
  0x9a   : > { %v395_v23 = vpop.permute.xlu1 %394 }
  0x9b   : > { %v405_v24 = vpop.permute.xlu0 %404  ;;  %v453_v6 = vsel %vm449_vm3, %v1527_v35, %v395_v23 }
  0x9c   : > { %v463_v2 = vsel %vm449_vm3, %v1490_v0, %v405_v24 }
  0x9d   : > { %v480_v26 = vsel %vm466_vm4, %v463_v2, %v446_v10 }
  0x9e   : > { %1274 = vmatprep.mubr.msk.bf16.mxu1 %vm490_vm5, %v480_v26  ;;  %v436_v29 = vpop.permute.xlu1 %435 }
  0x9f   : > { %1275 = vmatmul.mubr.msk.bf16.gmra.mxu1 %vm490_vm5, %v482_v28  ;;  %v434_v31 = vpop.permute.xlu0 %433  ;;  %v470_v0 = vsel %vm466_vm4, %v453_v6, %v436_v29 }
  0xa0   : > { %v468_v15 = vsel %vm466_vm4, %v451_v30, %v434_v31  ;;  %1280 = vmatprep.mubr.msk.bf16.mxu1 %vm490_vm5, %v470_v0 }
  0xa1   : > { %1262 = vmatprep.mubr.msk.bf16.mxu0 %vm490_vm5, %v468_v15 }
  0xa2   : > { %1263 = vmatmul.mubr.msk.bf16.vlgmr.msra.gmra.mxu0 %vm490_vm5, %v470_v0  ;;  %v438_v35 = vpop.permute.xlu1 %437 }
  0xa3   : > { %1297 = vmatpush3.bf16.msra.mxu0 %v855_v51  ;;  %v397_v33 = vpop.permute.xlu0 %396 }
  0xa4   : > { %v455_v34 = vsel %vm449_vm3, %v1545_v56, %v397_v33 }
  0xa5   : > { %v472_v27 = vsel %vm466_vm4, %v455_v34, %v438_v35 }
  0xa6   : > { %1266 = vmatprep.mubr.msk.bf16.mxu0 %vm490_vm5, %v472_v27  ;;  %v440_v36 = vpop.permute.xlu1 %439 }
  0xa7   : > { %v399_v37 = vpop.permute.xlu0 %398  ;;  %1281 = vmatmul.mubr.msk.bf16.vlgmr.msra.gmra.mxu1 %vm490_vm5, %v472_v27 }
  0xa8   : > { %v457_v38 = vsel %vm449_vm3, %v1552_v1, %v399_v37 }
  0xa9   : > { %v474_v39 = vsel %vm466_vm4, %v457_v38, %v440_v36 }
  0xaa   : > { %1267 = vmatmul.mubr.msk.bf16.gmra.mxu0 %vm490_vm5, %v474_v39  ;;  %1284 = vmatprep.mubr.msk.bf16.mxu1 %vm490_vm5, %v474_v39  ;;  %v650_v40 = vpop.permute.xlu1 %649 }
  0xab   : > { %1298 = vmatprep.mubr.msk.bf16.mxu0 %vm490_vm5, %v472_v27  ;;  %v645_v56 = vpop.permute.xlu0 %644 }
  0xac   : > { %v652_v1 = vsel %vm449_vm3, %v1556_v7, %v645_v56 }
  0xad   : > { %v654_v41 = vsel %vm466_vm4, %v652_v1, %v650_v40 }
  0xae   : > { %v839_v44 = vpop.permute.xlu1 %838 }
  0xaf   : > { %1285 = vmatmul.mubr.msk.bf16.gmra.mxu1 %vm490_vm5, %v476_v16  ;;  %v834_v42 = vpop.permute.xlu0 %833 }
  0xb0   : > { %1288 = vmatprep.mubr.msk.bf16.mxu1 %vm490_vm5, %v478_v20  ;;  %v841_v43 = vsel %vm449_vm3, %v1576_v32, %v834_v42 }
  0xb1   : > { %v843_v7 = vsel %vm466_vm4, %v841_v43, %v839_v44  ;;  %v1711_v43 = vld [vmem:[%s1804_s2] ss:$0 sm:$0xff] }
  0xb2   : > { %1299 = vmatmul.mubr.msk.bf16.vlgmr.msra.gmra.mxu0 %vm490_vm5, %v474_v39 }
  0xb3   : > { %1302 = vmatprep.mubr.msk.bf16.mxu0 %vm490_vm5, %v476_v16 }
  0xb7   : > { %1289 = vmatmul.mubr.msk.bf16.gmra.mxu1 %vm490_vm5, %v480_v26 }
  0xb8   : > { %1292 = vmatprep.mubr.msk.bf16.mxu1 %vm490_vm5, %v482_v28 }
  0xba   : > { %1303 = vmatmul.mubr.msk.bf16.gmra.mxu0 %vm490_vm5, %v478_v20 }
  0xbb   : > { %1306 = vmatprep.mubr.msk.bf16.mxu0 %vm490_vm5, %v480_v26 }
  0xbf   : > { %1293 = vmatmul.mubr.msk.bf16.gmra.mxu1 %vm490_vm5, %v654_v41 }
  0xc2   : > { %1307 = vmatmul.mubr.msk.bf16.gmra.mxu0 %vm490_vm5, %v482_v28 }
  0xc3   : > { %1310 = vmatprep.mubr.msk.bf16.mxu0 %vm490_vm5, %v654_v41 }
  0xca   : > { %1311 = vmatmul.mubr.msk.bf16.gmra.mxu0 %vm490_vm5, %v843_v7 }
 0x156   : > { %v1272_v45 = vpop.f32.mrf.mxu1 }
 0x157   : > { %618 = vst.msk [vmem:[#allocation2 + $0x50] sm:$0xff] %vm466_vm4, %v1272_v45 }
 0x158   : > { %v577_v46 = vpop.f32.mrf.mxu1 }
 0x159   : > { %616 = vst.msk [vmem:[#allocation2 + $0x40] sm:$0xff] %vm466_vm4, %v577_v46 }
 0x15a   : > { %v1273_v47 = vpop.f32.mrf.mxu1 }
 0x15b   : > { %619 = vst.msk [vmem:[#allocation2 + $0x58] sm:$0xff] %vm466_vm4, %v1273_v47 }
 0x15c   : > { %v580_v48 = vpop.f32.mrf.mxu1 }
 0x15d   : > { %617 = vst.msk [vmem:[#allocation2 + $0x48] sm:$0xff] %vm466_vm4, %v580_v48 }
 0x15e   : > { %v775_v0 = vld [vmem:[#allocation2 + $0x50] sm:$0xff] }
 0x15f   : > { %v1276_v49 = vpop.f32.mrf.mxu1 }
 0x160   : > { %622 = vst.msk [vmem:[#allocation2 + $0x70] sm:$0xff] %vm466_vm4, %v1276_v49  ;;  %v773_v38 = vld [vmem:[#allocation2 + $0x40] sm:$0xff] }
 0x161   : > { %v593_v32 = vpop.f32.mrf.mxu1 }
 0x162   : > { %620 = vst.msk [vmem:[#allocation2 + $0x60] sm:$0xff] %vm466_vm4, %v593_v32  ;;  %v1264_v50 = vpop.f32.mrf.mxu0  ;;  %v776_v42 = vld [vmem:[#allocation2 + $0x58] sm:$0xff] }
 0x163   : > { %610 = vst.msk [vmem:[#allocation2 + $0x10] sm:$0xff] %vm466_vm4, %v1264_v50  ;;  %v1277_v51 = vpop.f32.mrf.mxu1 }
 0x164   : > { %623 = vst.msk [vmem:[#allocation2 + $0x78] sm:$0xff] %vm466_vm4, %v1277_v51  ;;  %v545_v52 = vpop.f32.mrf.mxu0  ;;  %v774_v48 = vld [vmem:[#allocation2 + $0x48] sm:$0xff] }
 0x165   : > { %608 = vst.msk [vmem:[#allocation2] sm:$0xff] %vm466_vm4, %v545_v52  ;;  %v596_v53 = vpop.f32.mrf.mxu1 }
 0x166   : > { %621 = vst.msk [vmem:[#allocation2 + $0x68] sm:$0xff] %vm466_vm4, %v596_v53  ;;  %v1265_v54 = vpop.f32.mrf.mxu0 }
 0x167   : > { %611 = vst.msk [vmem:[#allocation2 + $0x18] sm:$0xff] %vm466_vm4, %v1265_v54  ;;  %v1282_v55 = vpop.f32.mrf.mxu1 }
 0x168   : > { %v548_v57 = vpop.f32.mrf.mxu0 }
 0x169   : > { %609 = vst.msk [vmem:[#allocation2 + $0x8] sm:$0xff] %vm466_vm4, %v548_v57  ;;  %v702_v58 = vpop.f32.mrf.mxu1 }
 0x16a   : > { %v767_v59 = vld [vmem:[#allocation2 + $0x10] sm:$0xff]  ;;  %v1268_v60 = vpop.f32.mrf.mxu0 }
 0x16b   : > { %v783_v61 = vadd.f32 %v1282_v55, %v767_v59  ;;  %614 = vst.msk [vmem:[#allocation2 + $0x30] sm:$0xff] %vm466_vm4, %v1268_v60  ;;  %v1283_v62 = vpop.f32.mrf.mxu1  ;;  %v779_v55 = vld [vmem:[#allocation2 + $0x70] sm:$0xff] }
 0x16c   : > { %v765_v63 = vld [vmem:[#allocation2] sm:$0xff]  ;;  %v561_v3 = vpop.f32.mrf.mxu0 }
 0x16d   : > { %799 = vst.msk [vmem:[#allocation2 + $0x10] sm:$0xff] %vm466_vm4, %v783_v61  ;;  %v781_v4 = vadd.f32 %v765_v63, %v702_v58  ;;  %612 = vst.msk [vmem:[#allocation2 + $0x20] sm:$0xff] %vm466_vm4, %v561_v3  ;;  %v705_v5 = vpop.f32.mrf.mxu1 }
 0x16e   : > { %v768_v8 = vld [vmem:[#allocation2 + $0x18] sm:$0xff]  ;;  %v1269_v9 = vpop.f32.mrf.mxu0 }
 0x16f   : > { %797 = vst.msk [vmem:[#allocation2] sm:$0xff] %vm466_vm4, %v781_v4  ;;  %v784_v10 = vadd.f32 %v1283_v62, %v768_v8  ;;  %615 = vst.msk [vmem:[#allocation2 + $0x38] sm:$0xff] %vm466_vm4, %v1269_v9  ;;  %v1286_v11 = vpop.f32.mrf.mxu1  ;;  %v777_v4 = vld [vmem:[#allocation2 + $0x60] sm:$0xff] }
 0x170   : > { %v766_v12 = vld [vmem:[#allocation2 + $0x8] sm:$0xff]  ;;  %v564_v13 = vpop.f32.mrf.mxu0 }
 0x171   : > { %800 = vst.msk [vmem:[#allocation2 + $0x18] sm:$0xff] %vm466_vm4, %v784_v10  ;;  %v782_v14 = vadd.f32 %v766_v12, %v705_v5  ;;  %613 = vst.msk [vmem:[#allocation2 + $0x28] sm:$0xff] %vm466_vm4, %v564_v13  ;;  %v718_v16 = vpop.f32.mrf.mxu1 }
 0x172   : > { %v771_v17 = vld [vmem:[#allocation2 + $0x30] sm:$0xff]  ;;  %v1300_v18 = vpop.f32.mrf.mxu0 }
 0x173   : > { %798 = vst.msk [vmem:[#allocation2 + $0x8] sm:$0xff] %vm466_vm4, %v782_v14  ;;  %v787_v19 = vadd.f32 %v1286_v11, %v771_v17  ;;  %v1287_v20 = vpop.f32.mrf.mxu1 }
 0x174   : > { %v769_v21 = vld [vmem:[#allocation2 + $0x20] sm:$0xff]  ;;  %v956_v22 = vld [vmem:[#allocation2 + $0x10] sm:$0xff]  ;;  %v891_v23 = vpop.f32.mrf.mxu0 }
 0x175   : > { %803 = vst.msk [vmem:[#allocation2 + $0x30] sm:$0xff] %vm466_vm4, %v787_v19  ;;  %v785_v24 = vadd.f32 %v769_v21, %v718_v16  ;;  %v972_v2 = vadd.f32 %v1300_v18, %v956_v22  ;;  %v721_v25 = vpop.f32.mrf.mxu1  ;;  %v780_v18 = vld [vmem:[#allocation2 + $0x78] sm:$0xff] }
 0x176   : > { %v772_v26 = vld [vmem:[#allocation2 + $0x38] sm:$0xff]  ;;  %v954_v28 = vld [vmem:[#allocation2] sm:$0xff]  ;;  %v1301_v6 = vpop.f32.mrf.mxu0 }
 0x177   : > { %801 = vst.msk [vmem:[#allocation2 + $0x20] sm:$0xff] %vm466_vm4, %v785_v24  ;;  %988 = vst.msk [vmem:[#allocation2 + $0x10] sm:$0xff] %vm466_vm4, %v972_v2  ;;  %v788_v29 = vadd.f32 %v1287_v20, %v772_v26  ;;  %v970_v30 = vadd.f32 %v954_v28, %v891_v23  ;;  %v1290_v31 = vpop.f32.mrf.mxu1  ;;  %v778_v26 = vld [vmem:[#allocation2 + $0x68] sm:$0xff] }
 0x178   : > { %v770_v15 = vld [vmem:[#allocation2 + $0x28] sm:$0xff]  ;;  %v957_v35 = vld [vmem:[#allocation2 + $0x18] sm:$0xff]  ;;  %v791_v33 = vadd.f32 %v1290_v31, %v775_v0  ;;  %v894_v34 = vpop.f32.mrf.mxu0 }
 0x179   : > { %804 = vst.msk [vmem:[#allocation2 + $0x38] sm:$0xff] %vm466_vm4, %v788_v29  ;;  %986 = vst.msk [vmem:[#allocation2] sm:$0xff] %vm466_vm4, %v970_v30  ;;  %v786_v27 = vadd.f32 %v770_v15, %v721_v25  ;;  %v973_v36 = vadd.f32 %v1301_v6, %v957_v35  ;;  %v734_v37 = vpop.f32.mrf.mxu1 }
 0x17a   : > { %807 = vst.msk [vmem:[#allocation2 + $0x50] sm:$0xff] %vm466_vm4, %v791_v33  ;;  %v955_v39 = vld [vmem:[#allocation2 + $0x8] sm:$0xff]  ;;  %v789_v56 = vadd.f32 %v773_v38, %v734_v37  ;;  %v1304_v1 = vpop.f32.mrf.mxu0 }
 0x17b   : > { %802 = vst.msk [vmem:[#allocation2 + $0x28] sm:$0xff] %vm466_vm4, %v786_v27  ;;  %989 = vst.msk [vmem:[#allocation2 + $0x18] sm:$0xff] %vm466_vm4, %v973_v36  ;;  %v971_v40 = vadd.f32 %v955_v39, %v894_v34  ;;  %v1291_v41 = vpop.f32.mrf.mxu1 }
 0x17c   : > { %805 = vst.msk [vmem:[#allocation2 + $0x40] sm:$0xff] %vm466_vm4, %v789_v56  ;;  %v960_v44 = vld [vmem:[#allocation2 + $0x30] sm:$0xff]  ;;  %v792_v7 = vadd.f32 %v1291_v41, %v776_v42  ;;  %v907_v45 = vpop.f32.mrf.mxu0 }
 0x17d   : > { %987 = vst.msk [vmem:[#allocation2 + $0x8] sm:$0xff] %vm466_vm4, %v971_v40  ;;  %v976_v46 = vadd.f32 %v1304_v1, %v960_v44  ;;  %v737_v47 = vpop.f32.mrf.mxu1 }
 0x17e   : > { %v1004_v49 = vld [vmem:[#allocation2 + $0x10] sm:$0xff]  ;;  %808 = vst.msk [vmem:[#allocation2 + $0x58] sm:$0xff] %vm466_vm4, %v792_v7  ;;  %v958_v32 = vld [vmem:[#allocation2 + $0x20] sm:$0xff]  ;;  %v790_v50 = vadd.f32 %v774_v48, %v737_v47  ;;  %v1305_v51 = vpop.f32.mrf.mxu0 }
 0x17f   : > { %v1027_v52 = vadd.f32 %v1711_v43, %v1004_v49  ;;  %992 = vst.msk [vmem:[#allocation2 + $0x30] sm:$0xff] %vm466_vm4, %v976_v46  ;;  %v974_v53 = vadd.f32 %v958_v32, %v907_v45  ;;  %v1294_v54 = vpop.f32.mrf.mxu1 }
 0x180   : > { %v1002_v57 = vld [vmem:[#allocation2] sm:$0xff]  ;;  %806 = vst.msk [vmem:[#allocation2 + $0x48] sm:$0xff] %vm466_vm4, %v790_v50  ;;  %v961_v58 = vld [vmem:[#allocation2 + $0x38] sm:$0xff]  ;;  %v795_v59 = vadd.f32 %v1294_v54, %v779_v55  ;;  %v910_v60 = vpop.f32.mrf.mxu0 }
 0x181   : > { %v1043_v61 = vmax.f32 %v1027_v52, 0.0  ;;  %v1025_v62 = vadd.f32 %v1711_v43, %v1002_v57  ;;  %990 = vst.msk [vmem:[#allocation2 + $0x20] sm:$0xff] %vm466_vm4, %v974_v53  ;;  %v977_v63 = vadd.f32 %v1305_v51, %v961_v58  ;;  %v750_v3 = vpop.f32.mrf.mxu1  ;;  %v964_v5 = vld [vmem:[#allocation2 + $0x50] sm:$0xff] }
 0x182   : > { %v1005_v8 = vld [vmem:[#allocation2 + $0x18] sm:$0xff]  ;;  %811 = vst.msk [vmem:[#allocation2 + $0x70] sm:$0xff] %vm466_vm4, %v795_v59  ;;  %v959_v9 = vld [vmem:[#allocation2 + $0x28] sm:$0xff]  ;;  %v793_v10 = vadd.f32 %v777_v4, %v750_v3  ;;  %v1308_v11 = vpop.f32.mrf.mxu0 }
 0x183   : > { %1059 = vst.msk [vmem:[%s1722_s20 + $0x10] sm:$0xff] %vm466_vm4, %v1043_v61  ;;  %v1041_v12 = vmax.f32 %v1025_v62, 0.0  ;;  %v1028_v13 = vadd.f32 %v1711_v43, %v1005_v8  ;;  %993 = vst.msk [vmem:[#allocation2 + $0x38] sm:$0xff] %vm466_vm4, %v977_v63  ;;  %v975_v14 = vadd.f32 %v959_v9, %v910_v60  ;;  %v980_v16 = vadd.f32 %v1308_v11, %v964_v5  ;;  %v1295_v17 = vpop.f32.mrf.mxu1  ;;  %v962_v19 = vld [vmem:[#allocation2 + $0x40] sm:$0xff] }
 0x184   : > { %v1003_v20 = vld [vmem:[#allocation2 + $0x8] sm:$0xff]  ;;  %809 = vst.msk [vmem:[#allocation2 + $0x60] sm:$0xff] %vm466_vm4, %v793_v10  ;;  %v796_v21 = vadd.f32 %v1295_v17, %v780_v18  ;;  %v923_v22 = vpop.f32.mrf.mxu0 }
 0x185   : > { %1057 = vst.msk [vmem:[%s1722_s20] sm:$0xff] %vm466_vm4, %v1041_v12  ;;  %v1044_v23 = vmax.f32 %v1028_v13, 0.0  ;;  %v1026_v24 = vadd.f32 %v1711_v43, %v1003_v20  ;;  %991 = vst.msk [vmem:[#allocation2 + $0x28] sm:$0xff] %vm466_vm4, %v975_v14  ;;  %v978_v2 = vadd.f32 %v962_v19, %v923_v22  ;;  %v753_v25 = vpop.f32.mrf.mxu1  ;;  %v965_v28 = vld [vmem:[#allocation2 + $0x58] sm:$0xff] }
 0x186   : > { %996 = vst.msk [vmem:[#allocation2 + $0x50] sm:$0xff] %vm466_vm4, %v980_v16  ;;  %v1008_v6 = vld [vmem:[#allocation2 + $0x30] sm:$0xff]  ;;  %812 = vst.msk [vmem:[#allocation2 + $0x78] sm:$0xff] %vm466_vm4, %v796_v21  ;;  %v794_v29 = vadd.f32 %v778_v26, %v753_v25  ;;  %v1309_v30 = vpop.f32.mrf.mxu0 }
 0x187   : > { %1060 = vst.msk [vmem:[%s1722_s20 + $0x18] sm:$0xff] %vm466_vm4, %v1044_v23  ;;  %v1042_v31 = vmax.f32 %v1026_v24, 0.0  ;;  %v1031_v0 = vadd.f32 %v1711_v43, %v1008_v6  ;;  %994 = vst.msk [vmem:[#allocation2 + $0x40] sm:$0xff] %vm466_vm4, %v978_v2  ;;  %v981_v15 = vadd.f32 %v1309_v30, %v965_v28  ;;  %v963_v35 = vld [vmem:[#allocation2 + $0x48] sm:$0xff] }
 0x188   : > { %v1006_v33 = vld [vmem:[#allocation2 + $0x20] sm:$0xff]  ;;  %810 = vst.msk [vmem:[#allocation2 + $0x68] sm:$0xff] %vm466_vm4, %v794_v29  ;;  %v926_v34 = vpop.f32.mrf.mxu0 }
 0x189   : > { %1058 = vst.msk [vmem:[%s1722_s20 + $0x8] sm:$0xff] %vm466_vm4, %v1042_v31  ;;  %v1047_v27 = vmax.f32 %v1031_v0, 0.0  ;;  %v1029_v36 = vadd.f32 %v1711_v43, %v1006_v33  ;;  %997 = vst.msk [vmem:[#allocation2 + $0x58] sm:$0xff] %vm466_vm4, %v981_v15  ;;  %v979_v37 = vadd.f32 %v963_v35, %v926_v34  ;;  %v968_v38 = vld [vmem:[#allocation2 + $0x70] sm:$0xff] }
 0x18a   : > { %v1009_v39 = vld [vmem:[#allocation2 + $0x38] sm:$0xff]  ;;  %v1312_v56 = vpop.f32.mrf.mxu0 }
 0x18b   : > { %1063 = vst.msk [vmem:[%s1722_s20 + $0x30] sm:$0xff] %vm466_vm4, %v1047_v27  ;;  %v1045_v1 = vmax.f32 %v1029_v36, 0.0  ;;  %v1032_v40 = vadd.f32 %v1711_v43, %v1009_v39  ;;  %995 = vst.msk [vmem:[#allocation2 + $0x48] sm:$0xff] %vm466_vm4, %v979_v37  ;;  %v984_v41 = vadd.f32 %v1312_v56, %v968_v38  ;;  %v966_v42 = vld [vmem:[#allocation2 + $0x60] sm:$0xff] }
 0x18c   : > { %v1007_v44 = vld [vmem:[#allocation2 + $0x28] sm:$0xff]  ;;  %v939_v45 = vpop.f32.mrf.mxu0 }
 0x18d   : > { %v1012_v7 = vld [vmem:[#allocation2 + $0x50] sm:$0xff]  ;;  %1061 = vst.msk [vmem:[%s1722_s20 + $0x20] sm:$0xff] %vm466_vm4, %v1045_v1  ;;  %v1048_v46 = vmax.f32 %v1032_v40, 0.0  ;;  %v1030_v47 = vadd.f32 %v1711_v43, %v1007_v44  ;;  %1000 = vst.msk [vmem:[#allocation2 + $0x70] sm:$0xff] %vm466_vm4, %v984_v41  ;;  %v982_v49 = vadd.f32 %v966_v42, %v939_v45  ;;  %v969_v32 = vld [vmem:[#allocation2 + $0x78] sm:$0xff] }
 0x18e   : > { %v1035_v48 = vadd.f32 %v1711_v43, %v1012_v7  ;;  %v1010_v50 = vld [vmem:[#allocation2 + $0x40] sm:$0xff]  ;;  %v1313_v51 = vpop.f32.mrf.mxu0 }
 0x18f   : > { %1064 = vst.msk [vmem:[%s1722_s20 + $0x38] sm:$0xff] %vm466_vm4, %v1048_v46  ;;  %v1046_v52 = vmax.f32 %v1030_v47, 0.0  ;;  %v1033_v54 = vadd.f32 %v1711_v43, %v1010_v50  ;;  %998 = vst.msk [vmem:[#allocation2 + $0x60] sm:$0xff] %vm466_vm4, %v982_v49  ;;  %v985_v55 = vadd.f32 %v1313_v51, %v969_v32  ;;  %v967_v57 = vld [vmem:[#allocation2 + $0x68] sm:$0xff] }
 0x190   : > { %v1051_v53 = vmax.f32 %v1035_v48, 0.0  ;;  %v1013_v58 = vld [vmem:[#allocation2 + $0x58] sm:$0xff]  ;;  %v942_v59 = vpop.f32.mrf.mxu0 }
 0x191   : > { %1062 = vst.msk [vmem:[%s1722_s20 + $0x28] sm:$0xff] %vm466_vm4, %v1046_v52  ;;  %v1049_v60 = vmax.f32 %v1033_v54, 0.0  ;;  %v1036_v61 = vadd.f32 %v1711_v43, %v1013_v58  ;;  %1001 = vst.msk [vmem:[#allocation2 + $0x78] sm:$0xff] %vm466_vm4, %v985_v55  ;;  %v983_v62 = vadd.f32 %v967_v57, %v942_v59 }
 0x192   : > { %1067 = vst.msk [vmem:[%s1722_s20 + $0x50] sm:$0xff] %vm466_vm4, %v1051_v53  ;;  %v1011_v63 = vld [vmem:[#allocation2 + $0x48] sm:$0xff] }
 0x193   : > { %1065 = vst.msk [vmem:[%s1722_s20 + $0x40] sm:$0xff] %vm466_vm4, %v1049_v60  ;;  %v1052_v3 = vmax.f32 %v1036_v61, 0.0  ;;  %v1034_v4 = vadd.f32 %v1711_v43, %v1011_v63  ;;  %999 = vst.msk [vmem:[#allocation2 + $0x68] sm:$0xff] %vm466_vm4, %v983_v62 }
 0x194   : > { %v1016_v5 = vld [vmem:[#allocation2 + $0x70] sm:$0xff] }
 0x195   : > { %1068 = vst.msk [vmem:[%s1722_s20 + $0x58] sm:$0xff] %vm466_vm4, %v1052_v3  ;;  %v1050_v8 = vmax.f32 %v1034_v4, 0.0  ;;  %v1039_v9 = vadd.f32 %v1711_v43, %v1016_v5 }
 0x196   : > { %v1014_v10 = vld [vmem:[#allocation2 + $0x60] sm:$0xff] }
 0x197   : > { %1066 = vst.msk [vmem:[%s1722_s20 + $0x48] sm:$0xff] %vm466_vm4, %v1050_v8  ;;  %v1055_v11 = vmax.f32 %v1039_v9, 0.0  ;;  %v1037_v12 = vadd.f32 %v1711_v43, %v1014_v10 }
 0x198   : > { %v1017_v13 = vld [vmem:[#allocation2 + $0x78] sm:$0xff] }
 0x199   : > { %1071 = vst.msk [vmem:[%s1722_s20 + $0x70] sm:$0xff] %vm466_vm4, %v1055_v11  ;;  %v1053_v14 = vmax.f32 %v1037_v12, 0.0  ;;  %v1040_v16 = vadd.f32 %v1711_v43, %v1017_v13 }
 0x19a   : > { %v1015_v17 = vld [vmem:[#allocation2 + $0x68] sm:$0xff] }
 0x19b   : > { %1069 = vst.msk [vmem:[%s1722_s20 + $0x60] sm:$0xff] %vm466_vm4, %v1053_v14  ;;  %v1056_v18 = vmax.f32 %v1040_v16, 0.0  ;;  %v1038_v19 = vadd.f32 %v1711_v43, %v1015_v17 }
 0x19d   : > { %1072 = vst.msk [vmem:[%s1722_s20 + $0x78] sm:$0xff] %vm466_vm4, %v1056_v18  ;;  %v1054_v20 = vmax.f32 %v1038_v19, 0.0 }
 0x19f   : > { %1070 = vst.msk [vmem:[%s1722_s20 + $0x68] sm:$0xff] %vm466_vm4, %v1054_v20 }
 0x1a0 PF: > { %s13_s16 = sadd.s32 1, %s1424_s16   ;;  %s1806_s12 = smov %s1416_s14 }
 0x1a1   : > { %p10_p7 = scmp.ge.s32.totalorder %s13_s16, 6   ;;  %s1807_s13 = smov %s1420_s15 }
 0x1a2   : > { %s1808_s14 = smov %s1811_s17  ;;  %s1809_s15 = smov %s1815_s18 }
 0x1a3   :  { %12 = sbr.rel (!%p10_p7) target bundleno = 3 (0x3), region = 65 }

</bundles_post_ra>
